<compile_context>
chip_gen: v7x
topology: tpu7x:2x2x1
jax: 0.10.0
libtpu: 0.0.40
codegen_flags: <defaults>
</compile_context>

<pallas_src>
import functools

import jax
import jax.numpy as jnp
from jax.experimental import pallas as pl
from jax.experimental.pallas import tpu as pltpu

_MiB = 1024 * 1024


def _linear_mxu_kernel(x_ref, w_ref, b_ref, o_ref, *, precision):
    # x_ref: (NB, C_in, tl)  w_ref: (C_out, C_in)  b_ref: (C_out, 1)
    # o_ref: (NB, C_out, tl)
    w = w_ref[...]
    b = b_ref[...].astype(jnp.float32)            # broadcasts along lanes
    for i in range(x_ref.shape[0]):               # NB is small and static
        acc = jnp.dot(w, x_ref[i], preferred_element_type=jnp.float32,
                      precision=precision)
        o_ref[i] = (acc + b).astype(o_ref.dtype)


def _linear_vpu_kernel(x_ref, w_ref, b_ref, o_ref):
    # Tiny-contraction fast path (C_in <= 8): unrolled broadcast-MAC on the VPU.
    w = w_ref[...].astype(jnp.float32)            # (C_out, C_in)
    b = b_ref[...].astype(jnp.float32)            # (C_out, 1)
    nb, c_in, tl = x_ref.shape
    c_out = w.shape[0]
    bias_tile = jnp.broadcast_to(b, (c_out, tl))  # hoisted out of the loops
    for i in range(nb):                           # NB small, static
        x = x_ref[i].astype(jnp.float32)          # (C_in, tl)
        acc = bias_tile
        for c in range(c_in):                     # static unroll, c_in <= 8
            acc = acc + w[:, c:c + 1] * x[c:c + 1, :]
        o_ref[i] = acc.astype(o_ref.dtype)


def _vmem_capacity_bytes():
    try:
        return int(pltpu.get_tpu_info().vmem_capacity_bytes)
    except Exception:
        return 64 * _MiB          # conservative fallback (v7x per-TC VMEM)


@functools.partial(
    jax.jit, static_argnames=("tl", "use_bf16", "out_dtype", "precision"))
def linear_1x1_conv(x_nchw, weight, bias, *, tl=None, use_bf16=False,
                    out_dtype=None, precision=None):
    """1x1 Conv2d forward.

    x_nchw: (N, C_in, H, W)
    weight: (C_out, C_in, 1, 1)   (PyTorch Conv2d weight layout)
    bias:   (C_out,)
    tl:     spatial tile override (None = derive from VMEM budget)
    use_bf16: cast x / weight to bf16 (f32 accumulation + f32 bias add)
    out_dtype: output dtype (None = x.dtype)
    precision: matmul precision for the f32 MXU path (None = default; note the
        default lowers f32 matmuls via bf16 passes — pass HIGHEST for bit
        accuracy at ~3-6x MXU cost, which is free on this memory-bound kernel)
    returns (N, C_out, H, W)
    """
    N, C_in, H, W = x_nchw.shape
    C_out = weight.shape[0]
    HW = H * W

    out_dtype = jnp.dtype(out_dtype) if out_dtype is not None else x_nchw.dtype

    # Free reshapes — no copies, no transposes.
    x_mat = x_nchw.reshape(N, C_in, HW)           # (N, C_in, HW)
    w_mat = weight.reshape(C_out, C_in)           # (C_out, C_in)
    b_mat = bias.reshape(C_out, 1)                # broadcast along lanes

    if use_bf16:
        x_mat = x_mat.astype(jnp.bfloat16)
        w_mat = w_mat.astype(jnp.bfloat16)

    x_isz = x_mat.dtype.itemsize
    w_isz = w_mat.dtype.itemsize
    o_isz = jnp.dtype(out_dtype).itemsize

    # --- batch blocking for small feature maps: amortize per-step overhead ---
    if HW <= 1024:
        NB = min(N, max(1, pl.cdiv(2048, HW)))    # target ~2K lanes per step
        NB = min(NB, 8)                           # bound the static unroll
    else:
        NB = 1

    # --- spatial tile from a per-generation VMEM budget ---
    vmem_cap = _vmem_capacity_bytes()
    budget = min((vmem_cap * 3) // 4, 64 * _MiB)  # ~48 MiB v7x, 64 MiB v5e/v6e
    w_resident = 2 * C_out * C_in * w_isz         # double-buffered weight
    per_lane = 2 * NB * (C_in * x_isz + C_out * o_isz)  # x + out double bufs
    avail = budget - w_resident - 1 * _MiB
    tl_budget = max(128, avail // per_lane)

    if tl is None:
        tl_cap = min(tl_budget, 8192)
    else:
        tl_cap = max(128, tl)

    if HW <= tl_cap:
        tl_eff = HW                               # full spatial extent
    else:
        tl_eff = max(128, (min(tl_cap, tl_budget) // 128) * 128)

    grid = (pl.cdiv(N, NB), pl.cdiv(HW, tl_eff))  # ragged tiles handled by Pallas

    # Explicit scoped-VMEM limit (v5e default is 16 MiB and would silently
    # cap the larger tiles; v7x physical VMEM is only 64 MiB).
    resident = (2 * NB * tl_eff * (C_in * x_isz + C_out * o_isz)
                + w_resident + 2 * C_out * 4)
    vmem_limit = max(resident + 8 * _MiB, 32 * _MiB)
    vmem_limit = int(min(vmem_limit, vmem_cap - 4 * _MiB))

    # Tiny contraction -> VPU broadcast-MAC; otherwise MXU matmul.
    if C_in <= 8:
        kernel = _linear_vpu_kernel
    else:
        kernel = functools.partial(_linear_mxu_kernel, precision=precision)

    flops = 2 * N * HW * C_in * C_out
    bytes_accessed = (x_mat.size * x_isz + w_mat.size * w_isz
                      + b_mat.size * b_mat.dtype.itemsize
                      + N * C_out * HW * o_isz)

    out = pl.pallas_call(
        kernel,
        out_shape=jax.ShapeDtypeStruct((N, C_out, HW), out_dtype),
        grid_spec=pltpu.PrefetchScalarGridSpec(
            num_scalar_prefetch=0,
            grid=grid,
            in_specs=[
                # x block: (NB, C_in, tl) — lane-dense spatial axis last.
                pl.BlockSpec((NB, C_in, tl_eff), lambda n, j: (n, 0, j)),
                # full weight, resident across the grid
                pl.BlockSpec((C_out, C_in), lambda n, j: (0, 0)),
                # full bias (C_out, 1)
                pl.BlockSpec((C_out, 1), lambda n, j: (0, 0)),
            ],
            out_specs=pl.BlockSpec((NB, C_out, tl_eff), lambda n, j: (n, 0, j)),
        ),
        compiler_params=pltpu.CompilerParams(
            dimension_semantics=("parallel", "parallel"),
            vmem_limit_bytes=vmem_limit,
        ),
        cost_estimate=pl.CostEstimate(
            flops=flops, transcendentals=0, bytes_accessed=bytes_accessed),
    )(x_mat, w_mat, b_mat)

    return out.reshape(N, C_out, H, W)            # free reshape back to NCHW


def _init_params(key, c_in, c_out, dtype=jnp.float32):
    """Deterministic Conv2d(1x1) init matching PyTorch's default."""
    k_w, k_b = jax.random.split(key)
    fan_in = c_in * 1 * 1
    bound_w = (1.0 / fan_in) ** 0.5 * (3.0 ** 0.5)   # kaiming_uniform(a=sqrt(5))
    weight = jax.random.uniform(k_w, (c_out, c_in, 1, 1), dtype,
                                minval=-bound_w, maxval=bound_w)
    bound_b = (1.0 / fan_in) ** 0.5
    bias = jax.random.uniform(k_b, (c_out,), dtype, minval=-bound_b, maxval=bound_b)
    return weight, bias


def _ref_conv1x1(x, weight, bias):
    c_out, c_in = weight.shape[0], weight.shape[1]
    return (jnp.einsum("nchw,oc->nohw", x, weight.reshape(c_out, c_in),
                       precision=jax.lax.Precision.HIGHEST)
            + bias[None, :, None, None])


if __name__ == "__main__":
    key = jax.random.PRNGKey(0)
    keys = jax.random.split(key, 8)

    # ---- Test 1: spec shapes (tiny channels -> VPU path, f32, NB batching) ----
    N, C_in, H, W, C_out = 2, 4, 16, 16, 8
    x1 = jax.random.normal(keys[0], (N, C_in, H, W), jnp.float32)
    w1, b1 = _init_params(keys[1], C_in, C_out)
    out1 = jax.block_until_ready(linear_1x1_conv(x1, w1, b1))
    ref1 = _ref_conv1x1(x1, w1, b1)
    assert out1.shape == (N, C_out, H, W)
    assert jnp.allclose(out1, ref1, atol=1e-5, rtol=1e-5)

    # ---- Test 2: MXU path, bf16 inputs AND bf16 output (bandwidth lever) ----
    N2, C_in2, H2, W2, C_out2 = 2, 64, 16, 16, 128
    x2 = jax.random.normal(keys[2], (N2, C_in2, H2, W2), jnp.float32)
    w2, b2 = _init_params(keys[3], C_in2, C_out2)
    out2 = jax.block_until_ready(
        linear_1x1_conv(x2, w2, b2, use_bf16=True, out_dtype=jnp.bfloat16))
    ref2 = _ref_conv1x1(x2, w2, b2)
    assert out2.shape == (N2, C_out2, H2, W2)
    assert out2.dtype == jnp.bfloat16
    assert jnp.allclose(out2.astype(jnp.float32), ref2, atol=5e-2, rtol=5e-2)

    # ---- Test 3: f32 MXU path, ragged spatial tiling + NB batch blocking ----
    N3, C_in3, H3, W3, C_out3 = 3, 16, 18, 20, 32      # HW = 360, tl = 128
    x3 = jax.random.normal(keys[4], (N3, C_in3, H3, W3), jnp.float32)
    w3, b3 = _init_params(keys[5], C_in3, C_out3)
    out3 = jax.block_until_ready(linear_1x1_conv(x3, w3, b3, tl=128))
    ref3 = _ref_conv1x1(x3, w3, b3)
    assert out3.shape == (N3, C_out3, H3, W3)
    # default-precision f32 matmul lowers via bf16 passes -> loose tolerance
    assert jnp.allclose(out3, ref3, atol=3e-2, rtol=3e-2)

    # ---- Test 4: ragged batch blocking (N=5, NB=2), VPU path, f32 ----
    N4, C_in4, H4, W4, C_out4 = 5, 8, 32, 32, 16       # HW = 1024
    x4 = jax.random.normal(keys[6], (N4, C_in4, H4, W4), jnp.float32)
    w4, b4 = _init_params(keys[7], C_in4, C_out4)
    out4 = jax.block_until_ready(linear_1x1_conv(x4, w4, b4))
    ref4 = _ref_conv1x1(x4, w4, b4)
    assert out4.shape == (N4, C_out4, H4, W4)
    assert jnp.allclose(out4, ref4, atol=1e-5, rtol=1e-5)

    print("KERNEL_OK")
</pallas_src>

<mosaic_0001>
module attributes {stable_mosaic.version = 11 : i64} {
  func.func @_linear_vpu_kernel(%arg0: i32, %arg1: i32, %arg2: memref<2x4x256xf32, #tpu.memory_space<vmem>>, %arg3: memref<8x4xf32, #tpu.memory_space<vmem>>, %arg4: memref<8x1xf32, #tpu.memory_space<vmem>>, %arg5: memref<2x8x256xf32, #tpu.memory_space<vmem>>) attributes {dimension_semantics = [#tpu.dimension_semantics<parallel>, #tpu.dimension_semantics<parallel>], iteration_bounds = array<i64: 1, 1>, scalar_prefetch = 0 : i64, scratch_operands = 0 : i64, tpu.core_type = #tpu.core_type<tc>, window_params = [{transform_indices = @transform_0, window_bounds = array<i64: 2, 4, 256>}, {pipeline_mode = #tpu.pipeline_mode<synchronous>, transform_indices = @transform_1, window_bounds = array<i64: 8, 4>}, {pipeline_mode = #tpu.pipeline_mode<synchronous>, transform_indices = @transform_2, window_bounds = array<i64: 8, 1>}, {transform_indices = @transform_3, window_bounds = array<i64: 2, 8, 256>}]} {
    %c0 = arith.constant 0 : index
    %c0_0 = arith.constant 0 : index
    %0 = vector.load %arg3[%c0, %c0_0] : memref<8x4xf32, #tpu.memory_space<vmem>>, vector<8x4xf32>
    %c0_1 = arith.constant 0 : index
    %c0_2 = arith.constant 0 : index
    %1 = vector.load %arg4[%c0_1, %c0_2] : memref<8x1xf32, #tpu.memory_space<vmem>>, vector<8x1xf32>
    %2 = vector.shape_cast %1 : vector<8x1xf32> to vector<8x1xf32>
    %3 = vector.broadcast %2 : vector<8x1xf32> to vector<8x256xf32>
    %c0_3 = arith.constant 0 : index
    %c0_4 = arith.constant 0 : index
    %c0_5 = arith.constant 0 : index
    %4 = vector.load %arg2[%c0_3, %c0_4, %c0_5] : memref<2x4x256xf32, #tpu.memory_space<vmem>>, vector<1x4x256xf32>
    %5 = vector.shape_cast %4 : vector<1x4x256xf32> to vector<4x256xf32>
    %6 = vector.extract_strided_slice %0 {offsets = [0, 0], sizes = [8, 1], strides = [1, 1]} : vector<8x4xf32> to vector<8x1xf32>
    %7 = vector.extract_strided_slice %5 {offsets = [0, 0], sizes = [1, 256], strides = [1, 1]} : vector<4x256xf32> to vector<1x256xf32>
    %8 = vector.broadcast %6 : vector<8x1xf32> to vector<8x256xf32>
    %9 = vector.broadcast %7 : vector<1x256xf32> to vector<8x256xf32>
    %10 = arith.mulf %8, %9 : vector<8x256xf32>
    %11 = arith.addf %3, %10 : vector<8x256xf32>
    %12 = vector.extract_strided_slice %0 {offsets = [0, 1], sizes = [8, 1], strides = [1, 1]} : vector<8x4xf32> to vector<8x1xf32>
    %13 = vector.extract_strided_slice %5 {offsets = [1, 0], sizes = [1, 256], strides = [1, 1]} : vector<4x256xf32> to vector<1x256xf32>
    %14 = vector.broadcast %12 : vector<8x1xf32> to vector<8x256xf32>
    %15 = vector.broadcast %13 : vector<1x256xf32> to vector<8x256xf32>
    %16 = arith.mulf %14, %15 : vector<8x256xf32>
    %17 = arith.addf %11, %16 : vector<8x256xf32>
    %18 = vector.extract_strided_slice %0 {offsets = [0, 2], sizes = [8, 1], strides = [1, 1]} : vector<8x4xf32> to vector<8x1xf32>
    %19 = vector.extract_strided_slice %5 {offsets = [2, 0], sizes = [1, 256], strides = [1, 1]} : vector<4x256xf32> to vector<1x256xf32>
    %20 = vector.broadcast %18 : vector<8x1xf32> to vector<8x256xf32>
    %21 = vector.broadcast %19 : vector<1x256xf32> to vector<8x256xf32>
    %22 = arith.mulf %20, %21 : vector<8x256xf32>
    %23 = arith.addf %17, %22 : vector<8x256xf32>
    %24 = vector.extract_strided_slice %0 {offsets = [0, 3], sizes = [8, 1], strides = [1, 1]} : vector<8x4xf32> to vector<8x1xf32>
    %25 = vector.extract_strided_slice %5 {offsets = [3, 0], sizes = [1, 256], strides = [1, 1]} : vector<4x256xf32> to vector<1x256xf32>
    %26 = vector.broadcast %24 : vector<8x1xf32> to vector<8x256xf32>
    %27 = vector.broadcast %25 : vector<1x256xf32> to vector<8x256xf32>
    %28 = arith.mulf %26, %27 : vector<8x256xf32>
    %29 = arith.addf %23, %28 : vector<8x256xf32>
    %c0_6 = arith.constant 0 : index
    %c0_7 = arith.constant 0 : index
    %c0_8 = arith.constant 0 : index
    %30 = vector.load %arg5[%c0_6, %c0_7, %c0_8] : memref<2x8x256xf32, #tpu.memory_space<vmem>>, vector<1x8x256xf32>
    %31 = vector.shape_cast %30 : vector<1x8x256xf32> to vector<8x256xf32>
    %32 = vector.shape_cast %29 : vector<8x256xf32> to vector<1x8x256xf32>
    tpu.vector_store %arg5[%c0_6, %c0_7, %c0_8], %32 {strides = array<i32>} : memref<2x8x256xf32, #tpu.memory_space<vmem>>, vector<1x8x256xf32>,
    %c1 = arith.constant 1 : index
    %c0_9 = arith.constant 0 : index
    %c0_10 = arith.constant 0 : index
    %33 = vector.load %arg2[%c1, %c0_9, %c0_10] : memref<2x4x256xf32, #tpu.memory_space<vmem>>, vector<1x4x256xf32>
    %34 = vector.shape_cast %33 : vector<1x4x256xf32> to vector<4x256xf32>
    %35 = vector.extract_strided_slice %0 {offsets = [0, 0], sizes = [8, 1], strides = [1, 1]} : vector<8x4xf32> to vector<8x1xf32>
    %36 = vector.extract_strided_slice %34 {offsets = [0, 0], sizes = [1, 256], strides = [1, 1]} : vector<4x256xf32> to vector<1x256xf32>
    %37 = vector.broadcast %35 : vector<8x1xf32> to vector<8x256xf32>
    %38 = vector.broadcast %36 : vector<1x256xf32> to vector<8x256xf32>
    %39 = arith.mulf %37, %38 : vector<8x256xf32>
    %40 = arith.addf %3, %39 : vector<8x256xf32>
    %41 = vector.extract_strided_slice %0 {offsets = [0, 1], sizes = [8, 1], strides = [1, 1]} : vector<8x4xf32> to vector<8x1xf32>
    %42 = vector.extract_strided_slice %34 {offsets = [1, 0], sizes = [1, 256], strides = [1, 1]} : vector<4x256xf32> to vector<1x256xf32>
    %43 = vector.broadcast %41 : vector<8x1xf32> to vector<8x256xf32>
    %44 = vector.broadcast %42 : vector<1x256xf32> to vector<8x256xf32>
    %45 = arith.mulf %43, %44 : vector<8x256xf32>
    %46 = arith.addf %40, %45 : vector<8x256xf32>
    %47 = vector.extract_strided_slice %0 {offsets = [0, 2], sizes = [8, 1], strides = [1, 1]} : vector<8x4xf32> to vector<8x1xf32>
    %48 = vector.extract_strided_slice %34 {offsets = [2, 0], sizes = [1, 256], strides = [1, 1]} : vector<4x256xf32> to vector<1x256xf32>
    %49 = vector.broadcast %47 : vector<8x1xf32> to vector<8x256xf32>
    %50 = vector.broadcast %48 : vector<1x256xf32> to vector<8x256xf32>
    %51 = arith.mulf %49, %50 : vector<8x256xf32>
    %52 = arith.addf %46, %51 : vector<8x256xf32>
    %53 = vector.extract_strided_slice %0 {offsets = [0, 3], sizes = [8, 1], strides = [1, 1]} : vector<8x4xf32> to vector<8x1xf32>
    %54 = vector.extract_strided_slice %34 {offsets = [3, 0], sizes = [1, 256], strides = [1, 1]} : vector<4x256xf32> to vector<1x256xf32>
    %55 = vector.broadcast %53 : vector<8x1xf32> to vector<8x256xf32>
    %56 = vector.broadcast %54 : vector<1x256xf32> to vector<8x256xf32>
    %57 = arith.mulf %55, %56 : vector<8x256xf32>
    %58 = arith.addf %52, %57 : vector<8x256xf32>
    %c1_11 = arith.constant 1 : index
    %c0_12 = arith.constant 0 : index
    %c0_13 = arith.constant 0 : index
    %59 = vector.load %arg5[%c1_11, %c0_12, %c0_13] : memref<2x8x256xf32, #tpu.memory_space<vmem>>, vector<1x8x256xf32>
    %60 = vector.shape_cast %59 : vector<1x8x256xf32> to vector<8x256xf32>
    %61 = vector.shape_cast %58 : vector<8x256xf32> to vector<1x8x256xf32>
    tpu.vector_store %arg5[%c1_11, %c0_12, %c0_13], %61 {strides = array<i32>} : memref<2x8x256xf32, #tpu.memory_space<vmem>>, vector<1x8x256xf32>,
    return
  }
  func.func @transform_0(%arg0: i32, %arg1: i32) -> (i32, i32, i32) {
    %c0_i32 = arith.constant 0 : i32
    %c0_i32_0 = arith.constant 0 : i32
    return %arg0, %c0_i32, %arg1 : i32, i32, i32
  }
  func.func @transform_1(%arg0: i32, %arg1: i32) -> (i32, i32) {
    %c0_i32 = arith.constant 0 : i32
    %c0_i32_0 = arith.constant 0 : i32
    %c0_i32_1 = arith.constant 0 : i32
    return %c0_i32, %c0_i32_0 : i32, i32
  }
  func.func @transform_2(%arg0: i32, %arg1: i32) -> (i32, i32) {
    %c0_i32 = arith.constant 0 : i32
    %c0_i32_0 = arith.constant 0 : i32
    %c0_i32_1 = arith.constant 0 : i32
    return %c0_i32, %c0_i32_0 : i32, i32
  }
  func.func @transform_3(%arg0: i32, %arg1: i32) -> (i32, i32, i32) {
    %c0_i32 = arith.constant 0 : i32
    %c0_i32_0 = arith.constant 0 : i32
    return %arg0, %c0_i32, %arg1 : i32, i32, i32
  }
}

</mosaic_0001>

<bundles_post_ra>
// kernel: linear_1x1_conv.1
= control target key start
LH: loop header
LB: loop body
LE: loop exit
PB: predicated region body
PF: predicated region fallthrough
CT: control target
= control target key end

     0   :  { %v239_v0 = vmov 0   ;;  %v240_v1 = vmov 1   ;;  %v241_v4 = vmov 2   ;;  %v242_v5 = vmov 3   ;;  %s295_s1 = inlined_call_operand.vmem [shape: f32[8,4], index: 1, kind: input, shape index: {}]   ;;  %s296_s2 = inlined_call_operand.vmem [shape: f32[8,1], index: 2, kind: input, shape index: {}]   ;;  %s297_s0 = inlined_call_operand.vmem [shape: f32[2,4,256], index: 0, kind: input, shape index: {}]   ;;  %s298_s3 = inlined_call_operand.vmem [shape: f32[2,8,256], index: 3, kind: output, shape index: {}]  }
   0x1   :  { %235 = vset.pattern.permute.xlu0 %v239_v0  ;;  %236 = vset.pattern.permute.xlu1 %v240_v1  ;;  %v14_v2 = vld [vmem:[%s295_s1] sm:$0xff]  ;;  %v28_v6 = vlaneseq  ;;  %v228_v11 = vld [vmem:[%s297_s0 + $0x8] sm:$0xff] }
   0x2   :  { %24 = vperm.xlu0 %235, %v14_v2   ;;  %51 = vperm.xlu1 %236, %v14_v2   ;;  %v15_v3 = vld [vmem:[%s296_s2] sm:$0xff] }
   0x3   :  { %v29_v7 = vshrl.u32 %v28_v6, 7  ;;  %v21_v10 = vld [vmem:[%s297_s0] sm:$0xff] }
   0x5   :  { %v30_v8 = vsub.s32 0, %v29_v7  ;;  %v34_v9 = vsub.s32 4, %v29_v7  ;;  %v56_v12 = vsub.s32 1, %v29_v7  ;;  %v60_v13 = vsub.s32 5, %v29_v7 }
   0x6   :  { %18 = vperm.xlu0 %235, %v15_v3   ;;  %237 = vset.pattern.permute.xlu1 %v241_v4  ;;  %v82_v14 = vsub.s32 2, %v29_v7  ;;  %v86_v15 = vsub.s32 6, %v29_v7  ;;  %v275_v16 = vsub.s32 3, %v29_v7  ;;  %v112_v17 = vsub.s32 7, %v29_v7 }
   0x7   :  { %77 = vperm.xlu1 %237, %v14_v2   ;;  %v31_v18 = vrot.slane %v21_v10, %v30_v8  ;;  %v35_v19 = vrot.slane %v21_v10, %v34_v9  ;;  %v136_v20 = vrot.slane %v228_v11, %v30_v8  ;;  %v140_v21 = vrot.slane %v228_v11, %v34_v9 }
   0x8   :  { %v57_v22 = vrot.slane %v21_v10, %v56_v12  ;;  %v61_v23 = vrot.slane %v21_v10, %v60_v13  ;;  %v158_v24 = vrot.slane %v228_v11, %v56_v12  ;;  %v162_v25 = vrot.slane %v228_v11, %v60_v13 }
   0x9   :  { %v83_v26 = vrot.slane %v21_v10, %v82_v14  ;;  %v87_v27 = vrot.slane %v21_v10, %v86_v15  ;;  %v180_v28 = vrot.slane %v228_v11, %v82_v14  ;;  %v184_v29 = vrot.slane %v228_v11, %v86_v15 }
   0xa   :  { %238 = vset.pattern.permute.xlu0 %v242_v5  ;;  %v109_v30 = vrot.slane %v21_v10, %v275_v16  ;;  %v113_v31 = vrot.slane %v21_v10, %v112_v17  ;;  %v202_v32 = vrot.slane %v228_v11, %v275_v16  ;;  %v206_v33 = vrot.slane %v228_v11, %v112_v17 }
   0xb   :  { %103 = vperm.xlu0 %238, %v14_v2   ;;  %v41_v34 = vrot.slane %v31_v18, %v30_v8  ;;  %v45_v35 = vrot.slane %v35_v19, %v30_v8  ;;  %v146_v36 = vrot.slane %v136_v20, %v30_v8  ;;  %v150_v37 = vrot.slane %v140_v21, %v30_v8 }
   0xc   :  { %v67_v40 = vrot.slane %v57_v22, %v56_v12  ;;  %v71_v41 = vrot.slane %v61_v23, %v56_v12  ;;  %v168_v42 = vrot.slane %v158_v24, %v56_v12  ;;  %v172_v43 = vrot.slane %v162_v25, %v56_v12 }
   0xd   :  { %v93_v44 = vrot.slane %v83_v26, %v82_v14  ;;  %v97_v45 = vrot.slane %v87_v27, %v82_v14  ;;  %v190_v46 = vrot.slane %v180_v28, %v82_v14  ;;  %v194_v47 = vrot.slane %v184_v29, %v82_v14 }
   0xe   :  { %v119_v48 = vrot.slane %v109_v30, %v275_v16  ;;  %v123_v49 = vrot.slane %v113_v31, %v275_v16  ;;  %v212_v50 = vrot.slane %v202_v32, %v275_v16  ;;  %v216_v51 = vrot.slane %v206_v33, %v275_v16 }
  0x81   :  { %v25_v38 = vpop.permute.xlu0 %24  ;;  %v52_v39 = vpop.permute.xlu1 %51 }
  0x82   :  { %v46_v52 = vmul.f32 %v41_v34, %v25_v38  ;;  %v47_v53 = vmul.f32 %v45_v35, %v25_v38  ;;  %v151_v54 = vmul.f32 %v146_v36, %v25_v38  ;;  %v152_v55 = vmul.f32 %v150_v37, %v25_v38 }
  0x83   :  { %v72_v56 = vmul.f32 %v67_v40, %v52_v39  ;;  %v73_v57 = vmul.f32 %v71_v41, %v52_v39  ;;  %v173_v58 = vmul.f32 %v168_v42, %v52_v39  ;;  %v174_v59 = vmul.f32 %v172_v43, %v52_v39 }
  0x85   :  { %v19_v60 = vpop.permute.xlu0 %18 }
  0x86   :  { %v48_v61 = vadd.f32 %v46_v52, %v19_v60  ;;  %v49_v62 = vadd.f32 %v47_v53, %v19_v60  ;;  %v153_v63 = vadd.f32 %v151_v54, %v19_v60  ;;  %v154_v0 = vadd.f32 %v152_v55, %v19_v60  ;;  %v78_v1 = vpop.permute.xlu1 %77 }
  0x87   :  { %v98_v2 = vmul.f32 %v93_v44, %v78_v1  ;;  %v99_v3 = vmul.f32 %v97_v45, %v78_v1  ;;  %v195_v4 = vmul.f32 %v190_v46, %v78_v1  ;;  %v196_v5 = vmul.f32 %v194_v47, %v78_v1 }
  0x88   :  { %v74_v6 = vadd.f32 %v72_v56, %v48_v61  ;;  %v75_v7 = vadd.f32 %v73_v57, %v49_v62  ;;  %v175_v8 = vadd.f32 %v173_v58, %v153_v63  ;;  %v176_v9 = vadd.f32 %v174_v59, %v154_v0 }
  0x8a   :  { %v100_v10 = vadd.f32 %v98_v2, %v74_v6  ;;  %v101_v11 = vadd.f32 %v99_v3, %v75_v7  ;;  %v197_v12 = vadd.f32 %v195_v4, %v175_v8  ;;  %v198_v13 = vadd.f32 %v196_v5, %v176_v9  ;;  %v104_v14 = vpop.permute.xlu0 %103 }
  0x8b   :  { %v124_v15 = vmul.f32 %v119_v48, %v104_v14  ;;  %v125_v16 = vmul.f32 %v123_v49, %v104_v14  ;;  %v217_v17 = vmul.f32 %v212_v50, %v104_v14  ;;  %v218_v18 = vmul.f32 %v216_v51, %v104_v14 }
  0x8d   :  { %v126_v19 = vadd.f32 %v124_v15, %v100_v10  ;;  %v127_v20 = vadd.f32 %v125_v16, %v101_v11  ;;  %v219_v21 = vadd.f32 %v217_v17, %v197_v12  ;;  %v220_v22 = vadd.f32 %v218_v18, %v198_v13 }
  0x8f   :  { %128 = vst [vmem:[%s298_s3] sm:$0xff] %v126_v19  ;;  %129 = vst [vmem:[%s298_s3 + $0x8] sm:$0xff] %v127_v20 }
  0x90   :  { %229 = vst [vmem:[%s298_s3 + $0x10] sm:$0xff] %v219_v21  ;;  %230 = vst [vmem:[%s298_s3 + $0x18] sm:$0xff] %v220_v22 }

</bundles_post_ra>
